<compile_context>
chip_gen: v6e
topology: v6e:2x2x1
jax: 0.10.0
libtpu: 0.0.40
codegen_flags: <defaults>
</compile_context>

<pallas_src>
import math

import jax
import jax.numpy as jnp
from jax.experimental import pallas as pl
from jax.experimental.pallas import tpu as pltpu

EPS_BN = 1e-5
EPS_LN = 1e-5


# ----------------------------------------------------------------------------
# In-kernel helpers
# ----------------------------------------------------------------------------
def _prep(t):
    # clamp(min=0.05) -> normalize over topics -> mix with uniform
    t = jnp.maximum(t, 0.05)
    inv = pl.reciprocal(jnp.sum(t, axis=1, keepdims=True), approx=True)  # EUP
    return 0.7 * (t * inv) + (0.3 / t.shape[1])


# ----------------------------------------------------------------------------
# Fused kernel, both topic distributions present.
#   vec rows: 0 = [b1_15' | b1_25']  (BN folded, width H/2)
#             1 = [b2_15  | b2_25 ]  (width H)
#             2 = [ln_g_15| ln_g_25]
#             3 = [ln_b_15| ln_b_25]
#             4 = bp
# ----------------------------------------------------------------------------
def fused_topic_kernel_both(t15_ref, t25_ref, w1a_ref, w1b_ref, w2_ref,
                            wp_ref, vec_ref, o_ref):
    H = o_ref.shape[1]
    H2 = H // 2

    t15 = _prep(t15_ref[...])
    t25 = _prep(t25_ref[...])

    # Layer 1 (BatchNorm folded): branch-15 -> lanes [0,H/4), branch-25 ->
    # lanes [H/4,H/2). Lane-padded weights avoid any in-kernel concatenate.
    h1 = (jnp.dot(t15, w1a_ref[...], preferred_element_type=jnp.float32)
          + jnp.dot(t25, w1b_ref[...], preferred_element_type=jnp.float32)
          + vec_ref[0:1, :H2])
    h1 = jnp.maximum(h1, 0.0)                 # ReLU; Dropout == identity

    # Layer 2: block-diagonal -> (B, H): branch-15 in [0,H/2), branch-25 in
    # [H/2,H).
    h2 = (jnp.dot(h1, w2_ref[...], preferred_element_type=jnp.float32)
          + vec_ref[1:2, :])

    # Two (H/2)-wide LayerNorms done as one 128-lane pass with segmented
    # (masked) reductions — no slicing / concatenation of the feature vector.
    lane = jax.lax.broadcasted_iota(jnp.int32, h2.shape, 1)
    in_a = lane < H2
    inv_n = 1.0 / H2
    sum_a = jnp.sum(jnp.where(in_a, h2, 0.0), axis=-1, keepdims=True)
    sum_b = jnp.sum(jnp.where(in_a, 0.0, h2), axis=-1, keepdims=True)
    mu = jnp.where(in_a, sum_a, sum_b) * inv_n
    d = h2 - mu
    d2 = d * d
    ss_a = jnp.sum(jnp.where(in_a, d2, 0.0), axis=-1, keepdims=True)
    ss_b = jnp.sum(jnp.where(in_a, 0.0, d2), axis=-1, keepdims=True)
    var = jnp.where(in_a, ss_a, ss_b) * inv_n
    f = d * jax.lax.rsqrt(var + EPS_LN) * vec_ref[2:3, :] + vec_ref[3:4, :]

    # cat([f15, f25], dim=1) @ Wp^T + bp  ==  f @ wp + bp   (single matmul)
    o_ref[...] = (jnp.dot(f, wp_ref[...], preferred_element_type=jnp.float32)
                  + vec_ref[4:5, :])


# ----------------------------------------------------------------------------
# Fused kernel, `topic_dist_25 is None` path: only the branch-15 encoder runs,
# and cat([f15, zeros]) @ Wp^T reduces to f15 @ Wp[:H/2].
# ----------------------------------------------------------------------------
def fused_topic_kernel_15(t15_ref, w1_ref, w2_ref, wp_ref, vec_ref, o_ref):
    H = o_ref.shape[1]
    H2, H4 = H // 2, H // 4

    t15 = _prep(t15_ref[...])
    h1 = jnp.maximum(
        jnp.dot(t15, w1_ref[...], preferred_element_type=jnp.float32)
        + vec_ref[0:1, :H4], 0.0)
    h2 = (jnp.dot(h1, w2_ref[...], preferred_element_type=jnp.float32)
          + vec_ref[1:2, :H2])
    mu = jnp.mean(h2, axis=-1, keepdims=True)
    d = h2 - mu
    var = jnp.mean(d * d, axis=-1, keepdims=True)
    f15 = d * jax.lax.rsqrt(var + EPS_LN) * vec_ref[2:3, :H2] + vec_ref[3:4, :H2]
    o_ref[...] = (jnp.dot(f15, wp_ref[...], preferred_element_type=jnp.float32)
                  + vec_ref[4:5, :])


# ----------------------------------------------------------------------------
# Wrapper
# ----------------------------------------------------------------------------
def multi_granularity_topic_forward(params, topic_dist, topic_dist_25=None,
                                    *, batch_tile=None):
    B = topic_dist.shape[0]
    H = params["wp"].shape[1]
    TB = B if batch_tile is None else batch_tile
    assert B % TB == 0 and TB % 8 == 0, "batch tile must divide B and be 8-aligned"
    grid = (B // TB,)

    row_map = lambda i: (i, 0)   # batch-tiled arrays
    rep_map = lambda i: (0, 0)   # parameters (same block every step)

    if topic_dist_25 is not None:
        kernel = fused_topic_kernel_both
        args = (topic_dist, topic_dist_25, params["w1a"], params["w1b"],
                params["w2_blk"], params["wp"], params["vec"])
        in_specs = [
            pl.BlockSpec((TB, topic_dist.shape[1]), row_map),
            pl.BlockSpec((TB, topic_dist_25.shape[1]), row_map),
            pl.BlockSpec(params["w1a"].shape, rep_map),
            pl.BlockSpec(params["w1b"].shape, rep_map),
            pl.BlockSpec(params["w2_blk"].shape, rep_map),
            pl.BlockSpec(params["wp"].shape, rep_map),
            pl.BlockSpec(params["vec"].shape, rep_map),
        ]
    else:
        kernel = fused_topic_kernel_15
        args = (topic_dist, params["w1_15"], params["w2_15"],
                params["wp_top"], params["vec"])
        in_specs = [
            pl.BlockSpec((TB, topic_dist.shape[1]), row_map),
            pl.BlockSpec(params["w1_15"].shape, rep_map),
            pl.BlockSpec(params["w2_15"].shape, rep_map),
            pl.BlockSpec(params["wp_top"].shape, rep_map),
            pl.BlockSpec(params["vec"].shape, rep_map),
        ]

    out_shape = jax.ShapeDtypeStruct((B, H), jnp.float32)
    return pl.pallas_call(
        kernel,
        out_shape=out_shape,
        grid=grid,
        in_specs=in_specs,
        out_specs=pl.BlockSpec((TB, H), row_map),
        compiler_params=pltpu.CompilerParams(
            dimension_semantics=("parallel",)),
    )(*args)


# ----------------------------------------------------------------------------
# Host-side parameter preparation: fold eval-mode BN into Linear1, build the
# lane-padded / block-diagonal weights and the packed (8, H) vector tile.
# ----------------------------------------------------------------------------
def prepare_params(raw, hidden_size):
    H = hidden_size
    H4, H2 = H // 4, H // 2

    def fold_bn(w, b, g, beta, mean, var):
        scale = g * jax.lax.rsqrt(var + EPS_BN)          # (1, H4)
        return w * scale, (b - mean) * scale + beta

    w1_15f, b1_15f = fold_bn(raw["w1_15"], raw["b1_15"], raw["bn_g_15"],
                             raw["bn_b_15"], raw["bn_m_15"], raw["bn_v_15"])
    w1_25f, b1_25f = fold_bn(raw["w1_25"], raw["b1_25"], raw["bn_g_25"],
                             raw["bn_b_25"], raw["bn_m_25"], raw["bn_v_25"])

    t15, t25 = raw["w1_15"].shape[0], raw["w1_25"].shape[0]
    # Lane-padded first layer: branch-15 writes lanes [0,H4), branch-25 [H4,H2)
    w1a = jnp.zeros((t15, H2), jnp.float32).at[:, :H4].set(w1_15f)
    w1b = jnp.zeros((t25, H2), jnp.float32).at[:, H4:].set(w1_25f)
    # Block-diagonal second layer
    w2_blk = (jnp.zeros((H2, H), jnp.float32)
              .at[:H4, :H2].set(raw["w2_15"])
              .at[H4:, H2:].set(raw["w2_25"]))
    # Packed small vectors: exactly one (8, H) lane-dense tile
    vec = jnp.zeros((8, H), jnp.float32)
    vec = vec.at[0, :H4].set(b1_15f[0]).at[0, H4:H2].set(b1_25f[0])
    vec = vec.at[1, :H2].set(raw["b2_15"][0]).at[1, H2:].set(raw["b2_25"][0])
    vec = vec.at[2, :H2].set(raw["ln_g_15"][0]).at[2, H2:].set(raw["ln_g_25"][0])
    vec = vec.at[3, :H2].set(raw["ln_b_15"][0]).at[3, H2:].set(raw["ln_b_25"][0])
    vec = vec.at[4, :].set(raw["bp"][0])

    return {
        "w1a": w1a, "w1b": w1b, "w2_blk": w2_blk, "wp": raw["wp"], "vec": vec,
        # `topic_dist_25 is None` fallback path (branch-25 work fully skipped)
        "w1_15": w1_15f, "w2_15": raw["w2_15"], "wp_top": raw["wp"][:H2, :],
    }


# ----------------------------------------------------------------------------
# Deterministic parameter initialization (matches PyTorch defaults)
# ----------------------------------------------------------------------------
def init_params(key, lda_topics=15, lda_topics_25=25, hidden_size=128):
    H = hidden_size
    H4, H2 = H // 4, H // 2
    keys = iter(jax.random.split(key, 8))

    def lin(k, fan_in, fan_out):
        k1, k2 = jax.random.split(k)
        s = 1.0 / math.sqrt(fan_in)
        w = jax.random.uniform(k1, (fan_in, fan_out), jnp.float32, -s, s)  # W^T
        b = jax.random.uniform(k2, (1, fan_out), jnp.float32, -s, s)
        return w, b

    params = {}
    for name, n_topics in (("15", lda_topics), ("25", lda_topics_25)):
        w1, b1 = lin(next(keys), n_topics, H4)
        w2, b2 = lin(next(keys), H4, H2)
        params.update({
            f"w1_{name}": w1, f"b1_{name}": b1,
            f"bn_g_{name}": jnp.ones((1, H4), jnp.float32),
            f"bn_b_{name}": jnp.zeros((1, H4), jnp.float32),
            f"bn_m_{name}": jnp.zeros((1, H4), jnp.float32),
            f"bn_v_{name}": jnp.ones((1, H4), jnp.float32),
            f"w2_{name}": w2, f"b2_{name}": b2,
            f"ln_g_{name}": jnp.ones((1, H2), jnp.float32),
            f"ln_b_{name}": jnp.zeros((1, H2), jnp.float32),
        })
    wp, bp = lin(next(keys), H, H)
    params["wp"] = wp
    params["bp"] = bp
    return params


if __name__ == "__main__":
    B = 8                 # batch (sublane-aligned)
    H = 128               # small hidden_size (lane-dense output store)
    T15, T25 = 15, 25     # module defaults

    key = jax.random.PRNGKey(0)
    k_param, k_a, k_b = jax.random.split(key, 3)
    params = prepare_params(init_params(k_param, T15, T25, H), H)

    topic_dist = jax.nn.softmax(
        jax.random.normal(k_a, (B, T15), jnp.float32), axis=-1)
    topic_dist_25 = jax.nn.softmax(
        jax.random.normal(k_b, (B, T25), jnp.float32), axis=-1)

    out = jax.block_until_ready(
        multi_granularity_topic_forward(params, topic_dist, topic_dist_25))
    assert out.shape == (B, H), out.shape
    assert bool(jnp.all(jnp.isfinite(out)))

    # `topic_dist_25 is None` placeholder path (reduced kernel, no zeros tensor)
    out_none = jax.block_until_ready(
        multi_granularity_topic_forward(params, topic_dist, None))
    assert out_none.shape == (B, H)
    assert bool(jnp.all(jnp.isfinite(out_none)))

    # Larger batch exercising the batch-tiled "parallel" grid path
    td_big = jax.nn.softmax(
        jax.random.normal(k_a, (16, T15), jnp.float32), axis=-1)
    td25_big = jax.nn.softmax(
        jax.random.normal(k_b, (16, T25), jnp.float32), axis=-1)
    out_tiled = jax.block_until_ready(
        multi_granularity_topic_forward(params, td_big, td25_big, batch_tile=8))
    assert out_tiled.shape == (16, H)
    assert bool(jnp.all(jnp.isfinite(out_tiled)))

    print("KERNEL_OK")
</pallas_src>

<mosaic_0001>
module attributes {stable_mosaic.version = 11 : i64} {
  func.func @fused_topic_kernel_both(%arg0: i32, %arg1: memref<8x15xf32, #tpu.memory_space<vmem>>, %arg2: memref<8x25xf32, #tpu.memory_space<vmem>>, %arg3: memref<15x64xf32, #tpu.memory_space<vmem>>, %arg4: memref<25x64xf32, #tpu.memory_space<vmem>>, %arg5: memref<64x128xf32, #tpu.memory_space<vmem>>, %arg6: memref<128x128xf32, #tpu.memory_space<vmem>>, %arg7: memref<8x128xf32, #tpu.memory_space<vmem>>, %arg8: memref<8x128xf32, #tpu.memory_space<vmem>>) attributes {dimension_semantics = [#tpu.dimension_semantics<parallel>], iteration_bounds = array<i64: 1>, scalar_prefetch = 0 : i64, scratch_operands = 0 : i64, tpu.core_type = #tpu.core_type<tc>, window_params = [{transform_indices = @transform_0, window_bounds = array<i64: 8, 15>}, {transform_indices = @transform_1, window_bounds = array<i64: 8, 25>}, {pipeline_mode = #tpu.pipeline_mode<synchronous>, transform_indices = @transform_2, window_bounds = array<i64: 15, 64>}, {pipeline_mode = #tpu.pipeline_mode<synchronous>, transform_indices = @transform_3, window_bounds = array<i64: 25, 64>}, {pipeline_mode = #tpu.pipeline_mode<synchronous>, transform_indices = @transform_4, window_bounds = array<i64: 64, 128>}, {pipeline_mode = #tpu.pipeline_mode<synchronous>, transform_indices = @transform_5, window_bounds = array<i64: 128, 128>}, {pipeline_mode = #tpu.pipeline_mode<synchronous>, transform_indices = @transform_6, window_bounds = array<i64: 8, 128>}, {transform_indices = @transform_7, window_bounds = array<i64: 8, 128>}]} {
    %c0 = arith.constant 0 : index
    %c0_0 = arith.constant 0 : index
    %0 = vector.load %arg1[%c0, %c0_0] : memref<8x15xf32, #tpu.memory_space<vmem>>, vector<8x15xf32>
    %cst = arith.constant 5.000000e-02 : f32
    %1 = vector.broadcast %cst : f32 to vector<8x15xf32>
    %2 = arith.maximumf %0, %1 : vector<8x15xf32>
    %cst_1 = arith.constant dense<0.000000e+00> : vector<8xf32>
    %3 = vector.multi_reduction <add>, %2, %cst_1 [1] : vector<8x15xf32> to vector<8xf32>
    %4 = vector.shape_cast %3 : vector<8xf32> to vector<8x1xf32>
    %5 = tpu.reciprocal %4 {approx = true} : vector<8x1xf32> -> vector<8x1xf32>
    %6 = vector.broadcast %5 : vector<8x1xf32> to vector<8x15xf32>
    %7 = arith.mulf %2, %6 : vector<8x15xf32>
    %cst_2 = arith.constant 0.699999988 : f32
    %8 = vector.broadcast %cst_2 : f32 to vector<8x15xf32>
    %9 = arith.mulf %8, %7 : vector<8x15xf32>
    %cst_3 = arith.constant 2.000000e-02 : f32
    %10 = vector.broadcast %cst_3 : f32 to vector<8x15xf32>
    %11 = arith.addf %9, %10 : vector<8x15xf32>
    %c0_4 = arith.constant 0 : index
    %c0_5 = arith.constant 0 : index
    %12 = vector.load %arg2[%c0_4, %c0_5] : memref<8x25xf32, #tpu.memory_space<vmem>>, vector<8x25xf32>
    %cst_6 = arith.constant 5.000000e-02 : f32
    %13 = vector.broadcast %cst_6 : f32 to vector<8x25xf32>
    %14 = arith.maximumf %12, %13 : vector<8x25xf32>
    %cst_7 = arith.constant dense<0.000000e+00> : vector<8xf32>
    %15 = vector.multi_reduction <add>, %14, %cst_7 [1] : vector<8x25xf32> to vector<8xf32>
    %16 = vector.shape_cast %15 : vector<8xf32> to vector<8x1xf32>
    %17 = tpu.reciprocal %16 {approx = true} : vector<8x1xf32> -> vector<8x1xf32>
    %18 = vector.broadcast %17 : vector<8x1xf32> to vector<8x25xf32>
    %19 = arith.mulf %14, %18 : vector<8x25xf32>
    %cst_8 = arith.constant 0.699999988 : f32
    %20 = vector.broadcast %cst_8 : f32 to vector<8x25xf32>
    %21 = arith.mulf %20, %19 : vector<8x25xf32>
    %cst_9 = arith.constant 1.200000e-02 : f32
    %22 = vector.broadcast %cst_9 : f32 to vector<8x25xf32>
    %23 = arith.addf %21, %22 : vector<8x25xf32>
    %c0_10 = arith.constant 0 : index
    %c0_11 = arith.constant 0 : index
    %24 = vector.load %arg3[%c0_10, %c0_11] : memref<15x64xf32, #tpu.memory_space<vmem>>, vector<15x64xf32>
    %cst_12 = arith.constant dense<0.000000e+00> : vector<8x64xf32>
    %25 = tpu.matmul %11, %24, %cst_12 {dimension_numbers = #tpu.dot_dimension_numbers<[1], [0], [0], [1], [0, 0, 1, 1], [], []>} : vector<8x15xf32>, vector<15x64xf32>, vector<8x64xf32> -> vector<8x64xf32>
    %c0_13 = arith.constant 0 : index
    %c0_14 = arith.constant 0 : index
    %26 = vector.load %arg4[%c0_13, %c0_14] : memref<25x64xf32, #tpu.memory_space<vmem>>, vector<25x64xf32>
    %cst_15 = arith.constant dense<0.000000e+00> : vector<8x64xf32>
    %27 = tpu.matmul %23, %26, %cst_15 {dimension_numbers = #tpu.dot_dimension_numbers<[1], [0], [0], [1], [0, 0, 1, 1], [], []>} : vector<8x25xf32>, vector<25x64xf32>, vector<8x64xf32> -> vector<8x64xf32>
    %28 = arith.addf %25, %27 : vector<8x64xf32>
    %c0_16 = arith.constant 0 : index
    %c0_17 = arith.constant 0 : index
    %29 = vector.load %arg7[%c0_16, %c0_17] : memref<8x128xf32, #tpu.memory_space<vmem>>, vector<1x64xf32>
    %30 = vector.broadcast %29 : vector<1x64xf32> to vector<8x64xf32>
    %31 = arith.addf %28, %30 : vector<8x64xf32>
    %cst_18 = arith.constant 0.000000e+00 : f32
    %32 = vector.broadcast %cst_18 : f32 to vector<8x64xf32>
    %33 = arith.maximumf %31, %32 : vector<8x64xf32>
    %c0_19 = arith.constant 0 : index
    %c0_20 = arith.constant 0 : index
    %34 = vector.load %arg5[%c0_19, %c0_20] : memref<64x128xf32, #tpu.memory_space<vmem>>, vector<64x128xf32>
    %cst_21 = arith.constant dense<0.000000e+00> : vector<8x128xf32>
    %35 = tpu.matmul %33, %34, %cst_21 {dimension_numbers = #tpu.dot_dimension_numbers<[1], [0], [0], [1], [0, 0, 1, 1], [], []>} : vector<8x64xf32>, vector<64x128xf32>, vector<8x128xf32> -> vector<8x128xf32>
    %c1 = arith.constant 1 : index
    %c0_22 = arith.constant 0 : index
    %36 = vector.load %arg7[%c1, %c0_22] : memref<8x128xf32, #tpu.memory_space<vmem>>, vector<1x128xf32>
    %37 = vector.broadcast %36 : vector<1x128xf32> to vector<8x128xf32>
    %38 = arith.addf %35, %37 : vector<8x128xf32>
    %39 = tpu.iota {dimensions = array<i32: 1>} : vector<8x128xi32>
    %c64_i32 = arith.constant 64 : i32
    %40 = vector.broadcast %c64_i32 : i32 to vector<8x128xi32>
    %41 = arith.cmpi slt, %39, %40 : vector<8x128xi32>
    %cst_23 = arith.constant 0.000000e+00 : f32
    %42 = vector.broadcast %cst_23 : f32 to vector<8x128xf32>
    %43 = arith.select %41, %38, %42 : vector<8x128xi1>, vector<8x128xf32>
    %cst_24 = arith.constant dense<0.000000e+00> : vector<8xf32>
    %44 = vector.multi_reduction <add>, %43, %cst_24 [1] : vector<8x128xf32> to vector<8xf32>
    %45 = vector.shape_cast %44 : vector<8xf32> to vector<8x1xf32>
    %cst_25 = arith.constant 0.000000e+00 : f32
    %46 = vector.broadcast %cst_25 : f32 to vector<8x128xf32>
    %47 = arith.select %41, %46, %38 : vector<8x128xi1>, vector<8x128xf32>
    %cst_26 = arith.constant dense<0.000000e+00> : vector<8xf32>
    %48 = vector.multi_reduction <add>, %47, %cst_26 [1] : vector<8x128xf32> to vector<8xf32>
    %49 = vector.shape_cast %48 : vector<8xf32> to vector<8x1xf32>
    %50 = vector.shape_cast %45 : vector<8x1xf32> to vector<8x1xf32>
    %51 = vector.broadcast %50 : vector<8x1xf32> to vector<8x128xf32>
    %52 = vector.shape_cast %49 : vector<8x1xf32> to vector<8x1xf32>
    %53 = vector.broadcast %52 : vector<8x1xf32> to vector<8x128xf32>
    %54 = arith.select %41, %51, %53 : vector<8x128xi1>, vector<8x128xf32>
    %cst_27 = arith.constant 1.562500e-02 : f32
    %55 = vector.broadcast %cst_27 : f32 to vector<8x128xf32>
    %56 = arith.mulf %54, %55 : vector<8x128xf32>
    %57 = arith.subf %38, %56 : vector<8x128xf32>
    %58 = arith.mulf %57, %57 : vector<8x128xf32>
    %cst_28 = arith.constant 0.000000e+00 : f32
    %59 = vector.broadcast %cst_28 : f32 to vector<8x128xf32>
    %60 = arith.select %41, %58, %59 : vector<8x128xi1>, vector<8x128xf32>
    %cst_29 = arith.constant dense<0.000000e+00> : vector<8xf32>
    %61 = vector.multi_reduction <add>, %60, %cst_29 [1] : vector<8x128xf32> to vector<8xf32>
    %62 = vector.shape_cast %61 : vector<8xf32> to vector<8x1xf32>
    %cst_30 = arith.constant 0.000000e+00 : f32
    %63 = vector.broadcast %cst_30 : f32 to vector<8x128xf32>
    %64 = arith.select %41, %63, %58 : vector<8x128xi1>, vector<8x128xf32>
    %cst_31 = arith.constant dense<0.000000e+00> : vector<8xf32>
    %65 = vector.multi_reduction <add>, %64, %cst_31 [1] : vector<8x128xf32> to vector<8xf32>
    %66 = vector.shape_cast %65 : vector<8xf32> to vector<8x1xf32>
    %67 = vector.shape_cast %62 : vector<8x1xf32> to vector<8x1xf32>
    %68 = vector.broadcast %67 : vector<8x1xf32> to vector<8x128xf32>
    %69 = vector.shape_cast %66 : vector<8x1xf32> to vector<8x1xf32>
    %70 = vector.broadcast %69 : vector<8x1xf32> to vector<8x128xf32>
    %71 = arith.select %41, %68, %70 : vector<8x128xi1>, vector<8x128xf32>
    %cst_32 = arith.constant 1.562500e-02 : f32
    %72 = vector.broadcast %cst_32 : f32 to vector<8x128xf32>
    %73 = arith.mulf %71, %72 : vector<8x128xf32>
    %cst_33 = arith.constant 9.99999974E-6 : f32
    %74 = vector.broadcast %cst_33 : f32 to vector<8x128xf32>
    %75 = arith.addf %73, %74 : vector<8x128xf32>
    %76 = math.rsqrt %75 : vector<8x128xf32>
    %77 = arith.mulf %57, %76 : vector<8x128xf32>
    %c2 = arith.constant 2 : index
    %c0_34 = arith.constant 0 : index
    %78 = vector.load %arg7[%c2, %c0_34] : memref<8x128xf32, #tpu.memory_space<vmem>>, vector<1x128xf32>
    %79 = vector.broadcast %78 : vector<1x128xf32> to vector<8x128xf32>
    %80 = arith.mulf %77, %79 : vector<8x128xf32>
    %c3 = arith.constant 3 : index
    %c0_35 = arith.constant 0 : index
    %81 = vector.load %arg7[%c3, %c0_35] : memref<8x128xf32, #tpu.memory_space<vmem>>, vector<1x128xf32>
    %82 = vector.broadcast %81 : vector<1x128xf32> to vector<8x128xf32>
    %83 = arith.addf %80, %82 : vector<8x128xf32>
    %c0_36 = arith.constant 0 : index
    %c0_37 = arith.constant 0 : index
    %84 = vector.load %arg6[%c0_36, %c0_37] : memref<128x128xf32, #tpu.memory_space<vmem>>, vector<128x128xf32>
    %cst_38 = arith.constant dense<0.000000e+00> : vector<8x128xf32>
    %85 = tpu.matmul %83, %84, %cst_38 {dimension_numbers = #tpu.dot_dimension_numbers<[1], [0], [0], [1], [0, 0, 1, 1], [], []>} : vector<8x128xf32>, vector<128x128xf32>, vector<8x128xf32> -> vector<8x128xf32>
    %c4 = arith.constant 4 : index
    %c0_39 = arith.constant 0 : index
    %86 = vector.load %arg7[%c4, %c0_39] : memref<8x128xf32, #tpu.memory_space<vmem>>, vector<1x128xf32>
    %87 = vector.broadcast %86 : vector<1x128xf32> to vector<8x128xf32>
    %88 = arith.addf %85, %87 : vector<8x128xf32>
    %c0_40 = arith.constant 0 : index
    %c0_41 = arith.constant 0 : index
    %89 = vector.load %arg8[%c0_40, %c0_41] : memref<8x128xf32, #tpu.memory_space<vmem>>, vector<8x128xf32>
    tpu.vector_store %arg8[%c0_40, %c0_41], %88 {strides = array<i32>} : memref<8x128xf32, #tpu.memory_space<vmem>>, vector<8x128xf32>,
    return
  }
  func.func @transform_0(%arg0: i32) -> (i32, i32) {
    %c0_i32 = arith.constant 0 : i32
    %c0_i32_0 = arith.constant 0 : i32
    return %arg0, %c0_i32 : i32, i32
  }
  func.func @transform_1(%arg0: i32) -> (i32, i32) {
    %c0_i32 = arith.constant 0 : i32
    %c0_i32_0 = arith.constant 0 : i32
    return %arg0, %c0_i32 : i32, i32
  }
  func.func @transform_2(%arg0: i32) -> (i32, i32) {
    %c0_i32 = arith.constant 0 : i32
    %c0_i32_0 = arith.constant 0 : i32
    %c0_i32_1 = arith.constant 0 : i32
    return %c0_i32, %c0_i32_0 : i32, i32
  }
  func.func @transform_3(%arg0: i32) -> (i32, i32) {
    %c0_i32 = arith.constant 0 : i32
    %c0_i32_0 = arith.constant 0 : i32
    %c0_i32_1 = arith.constant 0 : i32
    return %c0_i32, %c0_i32_0 : i32, i32
  }
  func.func @transform_4(%arg0: i32) -> (i32, i32) {
    %c0_i32 = arith.constant 0 : i32
    %c0_i32_0 = arith.constant 0 : i32
    %c0_i32_1 = arith.constant 0 : i32
    return %c0_i32, %c0_i32_0 : i32, i32
  }
  func.func @transform_5(%arg0: i32) -> (i32, i32) {
    %c0_i32 = arith.constant 0 : i32
    %c0_i32_0 = arith.constant 0 : i32
    %c0_i32_1 = arith.constant 0 : i32
    return %c0_i32, %c0_i32_0 : i32, i32
  }
  func.func @transform_6(%arg0: i32) -> (i32, i32) {
    %c0_i32 = arith.constant 0 : i32
    %c0_i32_0 = arith.constant 0 : i32
    %c0_i32_1 = arith.constant 0 : i32
    return %c0_i32, %c0_i32_0 : i32, i32
  }
  func.func @transform_7(%arg0: i32) -> (i32, i32) {
    %c0_i32 = arith.constant 0 : i32
    %c0_i32_0 = arith.constant 0 : i32
    return %arg0, %c0_i32 : i32, i32
  }
}

</mosaic_0001>

<bundles_post_ra>
// kernel: tpu_custom_call.1
= control target key start
LH: loop header
LB: loop body
LE: loop exit
PB: predicated region body
PF: predicated region fallthrough
CT: control target
= control target key end

     0   :  { %12 = vsyncpa [#allocation3], 0  ;;  %s964_s0 = inlined_call_operand.hbm [shape: f32[8,15], index: 0, kind: input, shape index: {}]   ;;  %s965_s1 = inlined_call_operand.hbm [shape: f32[8,25], index: 1, kind: input, shape index: {}]   ;;  %s966_s2 = inlined_call_operand.hbm [shape: f32[15,64], index: 2, kind: input, shape index: {}]   ;;  %s967_s3 = inlined_call_operand.hbm [shape: f32[25,64], index: 3, kind: input, shape index: {}]   ;;  %s968_s4 = inlined_call_operand.hbm [shape: f32[64,128], index: 4, kind: input, shape index: {}]   ;;  %s969_s5 = inlined_call_operand.hbm [shape: f32[128,128], index: 5, kind: input, shape index: {}]   ;;  %s970_s6 = inlined_call_operand.vmem [shape: f32[8,128], index: 6, kind: input, shape index: {}]   ;;  %s971_s7 = inlined_call_operand.hbm [shape: f32[8,128], index: 7, kind: output, shape index: {}]  }
   0x1   :  { %13 = vsyncpa [#allocation6], 0 }
   0x2   :  { %14 = vsyncpa [#allocation9], 0 }
   0x3   :  { %15 = vsyncpa [#allocation12], 0 }
   0x4   :  { %16 = vsyncpa [#allocation4], 0  ;;  %s808_s24 = smov [#allocation5]  }
   0x5   :  { %s33_s25 = sshll.u32 %s808_s24, 4  ;;  %s34_s25 = int_to_ptr.vmem [resolvable:$true] %s33_s25 }
   0x6   :  { %s666_s26 = scalar_lea.vmem %s34_s25, 128  ;;  %p671_p1 = scmp.lt.s32.totalorder %s34_s25, %s34_s25 }
   0x7   :  { %p667_p0 = scmp.ne.s32.totalorder %s34_s25, %s666_s26  ;;  %p672_p2 = scmp.lt.s32.totalorder %s666_s26, %s666_s26 }
   0x9   :  { %p673_p3 = por %p672_p2, %p671_p1 }
   0xb   :  { %p674_p4 = pnand %p673_p3, %p667_p0 }
   0xd   :  { %677 = shalt.err (!%p674_p4)
}
   0xe   :  { %36 = dma.hbm_to_vmem [thread:$0]  %s965_s1, 128, %s34_s25, [#allocation6]  }
   0xf   :  { %s809_s29 = smov [#allocation8]   ;;  %s810_s8 = smov [#allocation2]  }
  0x10   :  { %s54_s30 = sshll.u32 %s809_s29, 4  ;;  %s23_s9 = sshll.u32 %s810_s8, 4  ;;  %s55_s30 = int_to_ptr.vmem [resolvable:$true] %s54_s30  ;;  %s24_s9 = int_to_ptr.vmem [resolvable:$true] %s23_s9 }
  0x11   :  { %s686_s10 = scalar_lea.vmem %s55_s30, 512  ;;  %p691_p6 = scmp.lt.s32.totalorder %s55_s30, %s55_s30 }
  0x12   :  { %p687_p5 = scmp.ne.s32.totalorder %s55_s30, %s686_s10  ;;  %p692_p7 = scmp.lt.s32.totalorder %s686_s10, %s686_s10 }
  0x14   :  { %p693_p8 = por %p692_p7, %p691_p6 }
  0x16   :  { %p694_p9 = pnand %p693_p8, %p687_p5 }
  0x18   :  { %697 = shalt.err (!%p694_p9)
}
  0x19   :  { %s811_s11 = smov 128   ;;  %s812_s12 = smov 8  }
  0x1a   :  { %60 = dma.hbm_to_vmem [thread:$0]  %s967_s3, 512, %s55_s30, [#allocation9], %s811_s11, %s811_s11, %s812_s12  }
  0x1b   :  { %s706_s1 = scalar_lea.vmem %s24_s9, 128  ;;  %p711_p11 = scmp.lt.s32.totalorder %s24_s9, %s24_s9 }
  0x1c   :  { %p707_p10 = scmp.ne.s32.totalorder %s24_s9, %s706_s1  ;;  %p712_p12 = scmp.lt.s32.totalorder %s706_s1, %s706_s1 }
  0x1e   :  { %p713_p13 = por %p712_p12, %p711_p11 }
  0x20   :  { %p714_p0 = pnand %p713_p13, %p707_p10 }
  0x22   :  { %717 = shalt.err (!%p714_p0)
}
  0x23   :  { %26 = dma.hbm_to_vmem [thread:$0]  %s964_s0, 128, %s24_s9, [#allocation3]  }
  0x24   :  { %s813_s17 = smov [#allocation7]   ;;  %s814_s19 = smov [#allocation10]  }
  0x25   :  { %s42_s18 = sshll.u32 %s813_s17, 4  ;;  %s66_s20 = sshll.u32 %s814_s19, 4  ;;  %s43_s18 = int_to_ptr.vmem [resolvable:$true] %s42_s18  ;;  %s67_s20 = int_to_ptr.vmem [resolvable:$true] %s66_s20 }
  0x26   :  { %s726_s21 = scalar_lea.vmem %s43_s18, 256  ;;  %p731_p2 = scmp.lt.s32.totalorder %s43_s18, %s43_s18 }
  0x27   :  { %p727_p1 = scmp.ne.s32.totalorder %s43_s18, %s726_s21  ;;  %p732_p3 = scmp.lt.s32.totalorder %s726_s21, %s726_s21 }
  0x29   :  { %p733_p4 = por %p732_p3, %p731_p2 }
  0x2b   :  { %p734_p5 = pnand %p733_p4, %p727_p1 }
  0x2d   :  { %737 = shalt.err (!%p734_p5)
}
  0x2e   :  { %48 = dma.hbm_to_vmem [thread:$0]  %s966_s2, 256, %s43_s18, [#allocation6], %s811_s11, %s811_s11, %s812_s12  }
  0x2f   :  { %s746_s0 = scalar_lea.vmem %s67_s20, 1024  ;;  %p751_p7 = scmp.lt.s32.totalorder %s67_s20, %s67_s20 }
  0x30   :  { %p747_p6 = scmp.ne.s32.totalorder %s67_s20, %s746_s0  ;;  %p752_p8 = scmp.lt.s32.totalorder %s746_s0, %s746_s0 }
  0x32   :  { %p753_p9 = por %p752_p8, %p751_p7 }
  0x34   :  { %p754_p10 = pnand %p753_p9, %p747_p6 }
  0x36   :  { %757 = shalt.err (!%p754_p10)
}
  0x37   :  { %72 = dma.hbm_to_vmem [thread:$0]  %s968_s4, 1024, %s67_s20, [#allocation9], %s811_s11, %s811_s11, %s812_s12  }
  0x38   :  { %s815_s25 = smov [#allocation11]  }
  0x39   :  { %s78_s26 = sshll.u32 %s815_s25, 4  ;;  %s79_s26 = int_to_ptr.vmem [resolvable:$true] %s78_s26 }
  0x3a   :  { %s766_s27 = scalar_lea.vmem %s79_s26, 2048  ;;  %p771_p12 = scmp.lt.s32.totalorder %s79_s26, %s79_s26 }
  0x3b   :  { %p767_p11 = scmp.ne.s32.totalorder %s79_s26, %s766_s27  ;;  %p772_p13 = scmp.lt.s32.totalorder %s766_s27, %s766_s27 }
  0x3d   :  { %p773_p0 = por %p772_p13, %p771_p12 }
  0x3f   :  { %p774_p1 = pnand %p773_p0, %p767_p11 }
  0x41   :  { %777 = shalt.err (!%p774_p1)
}
  0x42   :  { %84 = dma.hbm_to_vmem [thread:$0]  %s969_s5, 2048, %s79_s26, [#allocation12], %s811_s11, %s811_s11, %s812_s12  }
  0x43   :  { %798 = dma.done.wait [#allocation3], 128  }
  0x44   :  { %799 = vsyncadd [#allocation3], 4294967168 }
  0x45   :  { %800 = dma.done.wait [#allocation6], 384  }
  0x46   :  { %801 = vsyncadd [#allocation6], 4294966912 }
  0x47   :  { %802 = dma.done.wait [#allocation9], 1536  }
  0x48   :  { %803 = vsyncadd [#allocation9], 4294965760 }
  0x49   :  { %804 = dma.done.wait [#allocation12], 2048  }
  0x4a   :  { %805 = vsyncadd [#allocation12], 4294965248  ;;  %v115_v0 = vld [vmem:[#allocation5] sm:$0xff]  ;;  %vm117_vm0 = vcmask 203776   ;;  %v105_v1 = vld [vmem:[#allocation2] sm:$0xff]  ;;  %vm107_vm1 = vcmask 121856   ;;  %v379_v39 = vlaneseq }
  0x4b   :  { %v116_v2 = vmax.f32 %v115_v0, 0.05  ;;  %v106_v3 = vmax.f32 %v105_v1, 0.05  ;;  %v130_v6 = vld [vmem:[#allocation8 + $0x18] sm:$0x1] }
  0x4c   :  { %vm134_vm2 = vcmask 1040384   ;;  %v816_v7 = vmov 0.0   ;;  %v129_v8 = vld [vmem:[#allocation8 + $0x10] sm:$0xff]  ;;  %vm817_vm3 = vmmov 0   ;;  %v128_v9 = vld [vmem:[#allocation8 + $0x8] sm:$0xff]  ;;  %v127_v10 = vld [vmem:[#allocation8] sm:$0xff] }
  0x4d   :  { %v118_v4 = vsel %vm117_vm0, %v116_v2, 0.0  ;;  %v108_v5 = vsel %vm107_vm1, %v106_v3, 0.0  ;;  %569 = vmatprep.subr.mxu1 %v816_v7  ;;  %606 = vmatprep.subr.mxu0 %v816_v7  ;;  %v126_v18 = vld [vmem:[#allocation7 + $0x8] sm:$0x7f]  ;;  %vm211_vm4 = vcmask 1046528   ;;  %v125_v20 = vld [vmem:[#allocation7] sm:$0xff] }
  0x4e   :  { %119 = vadd.xlane.f32.xlu0 %v118_v4  ;;  %570 = vmatpush3.msk.msra.mxu1 %vm134_vm2, %v130_v6  ;;  %v299_v23 = vld [vmem:[#allocation10 + $0x38] sm:$0xff]  ;;  %v298_v24 = vld [vmem:[#allocation10 + $0x30] sm:$0xff]  ;;  %v297_v25 = vld [vmem:[#allocation10 + $0x28] sm:$0xff]  ;;  %vm305_vm5 = vcmask 523264   ;;  %v919_v40 = vand.u32 127, %v379_v39  ;;  %s818_s14 = smov [#allocation13]  }
  0x4f   :  { %577 = vmatprep.mubr.msk.f32.mxu1 %vm817_vm3, %v816_v7  ;;  %571 = vmatprep.subr.mxu1 %v816_v7  ;;  %v296_v26 = vld [vmem:[#allocation10 + $0x20] sm:$0xff]  ;;  %v295_v27 = vld [vmem:[#allocation10 + $0x18] sm:$0xff]  ;;  %v294_v28 = vld [vmem:[#allocation10 + $0x10] sm:$0xff]  ;;  %s513_s1 = sshll.u32 %s818_s14, 4  ;;  %s514_s1 = int_to_ptr.vmem [resolvable:$true] %s513_s1 }
  0x50   :  { %638 = vmatprep.mubr.msk.f32.mxu0 %vm817_vm3, %v816_v7  ;;  %572 = vmatpush3.msra.mxu1 %v129_v8  ;;  %v293_v29 = vld [vmem:[#allocation10 + $0x8] sm:$0xff]  ;;  %v292_v30 = vld [vmem:[#allocation10] sm:$0xff]  ;;  %vm381_vm6 = vcmp.lt.s32.totalorder %v919_v40, 64  ;;  %v430_v47 = vld [vmem:[#allocation11 + $0x78] sm:$0xff]  ;;  %s778_s15 = scalar_lea.vmem %s514_s1, 128  ;;  %p783_p3 = scmp.lt.s32.totalorder %s514_s1, %s514_s1 }
  0x51   :  { %573 = vmatprep.subr.mxu1 %v816_v7  ;;  %v529_v34 = vld [vmem:[%s970_s6] ss:$0 sm:$0xff]  ;;  %v530_v41 = vld [vmem:[%s970_s6 + $0x1] ss:$0 sm:$0xff]  ;;  %v429_v48 = vld [vmem:[#allocation11 + $0x70] sm:$0xff]  ;;  %607 = vmatpush3.msra.mxu0 %v430_v47  ;;  %p779_p2 = scmp.ne.s32.totalorder %s514_s1, %s778_s15  ;;  %p784_p4 = scmp.lt.s32.totalorder %s778_s15, %s778_s15 }
  0x52   :  { %109 = vadd.xlane.f32.xlu0 %v108_v5  ;;  %574 = vmatpush3.msra.mxu1 %v128_v9  ;;  %v428_v49 = vld [vmem:[#allocation11 + $0x68] sm:$0xff]  ;;  %v427_v58 = vld [vmem:[#allocation11 + $0x60] sm:$0xff]  ;;  %v426_v59 = vld [vmem:[#allocation11 + $0x58] sm:$0xff] }
  0x53   :  { %575 = vmatprep.subr.mxu1 %v816_v7  ;;  %608 = vmatprep.subr.mxu0 %v816_v7  ;;  %v425_v60 = vld [vmem:[#allocation11 + $0x50] sm:$0xff]  ;;  %v424_v61 = vld [vmem:[#allocation11 + $0x48] sm:$0xff]  ;;  %v423_v62 = vld [vmem:[#allocation11 + $0x40] sm:$0xff]  ;;  %p785_p5 = por %p784_p4, %p783_p3 }
  0x54   :  { %576 = vmatpush3.msra.mxu1 %v127_v10  ;;  %609 = vmatpush3.msra.mxu0 %v429_v48  ;;  %v422_v63 = vld [vmem:[#allocation11 + $0x38] sm:$0xff]  ;;  %v421_v0 = vld [vmem:[#allocation11 + $0x30] sm:$0xff]  ;;  %v420_v1 = vld [vmem:[#allocation11 + $0x28] sm:$0xff] }
  0x55   :  { %580 = vmatprep.subr.mxu1 %v816_v7  ;;  %610 = vmatprep.subr.mxu0 %v816_v7  ;;  %v417_v4 = vld [vmem:[#allocation11 + $0x10] sm:$0xff]  ;;  %v416_v5 = vld [vmem:[#allocation11 + $0x8] sm:$0xff]  ;;  %v415_v6 = vld [vmem:[#allocation11] sm:$0xff]  ;;  %p786_p6 = pnand %p785_p5, %p779_p2 }
  0x56   :  { %611 = vmatpush3.msra.mxu0 %v428_v49 }
  0x57   :  { %612 = vmatprep.subr.mxu0 %v816_v7 }
  0x58   :  { %613 = vmatpush3.msra.mxu0 %v427_v58 }
  0x59   :  { %614 = vmatprep.subr.mxu0 %v816_v7 }
  0x5a   :  { %615 = vmatpush3.msra.mxu0 %v426_v59 }
  0x5b   :  { %616 = vmatprep.subr.mxu0 %v816_v7 }
  0x5c   :  { %617 = vmatpush3.msra.mxu0 %v425_v60 }
  0x5d   :  { %618 = vmatprep.subr.mxu0 %v816_v7 }
  0x5e   :  { %619 = vmatpush3.msra.mxu0 %v424_v61 }
  0x5f   :  { %620 = vmatprep.subr.mxu0 %v816_v7 }
  0x60   :  { %621 = vmatpush3.msra.mxu0 %v423_v62 }
  0x61   :  { %622 = vmatprep.subr.mxu0 %v816_v7 }
  0x62   :  { %623 = vmatpush3.msra.mxu0 %v422_v63 }
  0x63   :  { %624 = vmatprep.subr.mxu0 %v816_v7 }
  0x64   :  { %625 = vmatpush3.msra.mxu0 %v421_v0 }
  0x65   :  { %626 = vmatprep.subr.mxu0 %v816_v7 }
  0x66   :  { %627 = vmatpush3.msra.mxu0 %v420_v1 }
  0x67   :  { %628 = vmatprep.subr.mxu0 %v816_v7 }
  0xd7   :  { %v120_v11 = vpop.xlane.xlu0 %119 }
  0xd8   :  { %652 = vrcp.f32 %v120_v11 }
  0xdb   :  { %v110_v12 = vpop.xlane.xlu0 %109 }
  0xdc   :  { %654 = vrcp.f32 %v110_v12 }
  0xe5   :  { %v653_v13 = vpop.eup %652 }
  0xe6   :  { %v122_v14 = vmul.f32 %v653_v13, %v116_v2  ;;  %v419_v2 = vld [vmem:[#allocation11 + $0x20] sm:$0xff] }
  0xe7   :  { %629 = vmatpush3.msra.mxu0 %v419_v2 }
  0xe8   :  { %v123_v15 = vmul.f32 0.7, %v122_v14  ;;  %630 = vmatprep.subr.mxu0 %v816_v7  ;;  %v532_v14 = vld [vmem:[%s970_s6 + $0x2] ss:$0 sm:$0xff] }
  0xe9   :  { %v655_v16 = vpop.eup %654 }
  0xea   :  { %v124_v17 = vadd.f32 0.012, %v123_v15  ;;  %v112_v19 = vmul.f32 %v655_v16, %v106_v3  ;;  %v418_v3 = vld [vmem:[#allocation11 + $0x18] sm:$0xff]  ;;  %v533_v16 = vld [vmem:[%s970_s6 + $0x3] ss:$0 sm:$0xff] }
  0xeb   :  { %631 = vmatpush3.msra.mxu0 %v418_v3 }
  0xec   :  { %578 = vmatmul.mubr.msk.f32.vlgmr.msra.gmra.mxu1 %vm117_vm0, %v124_v17  ;;  %v113_v21 = vmul.f32 0.7, %v112_v19  ;;  %632 = vmatprep.subr.mxu0 %v816_v7 }
  0xed   :  { %581 = vmatpush3.msk.msra.mxu1 %vm211_vm4, %v126_v18  ;;  %584 = vmatprep.mubr.msk.f32.mxu1 %vm817_vm3, %v816_v7  ;;  %v534_v18 = vld [vmem:[%s970_s6 + $0x4] ss:$0 sm:$0xff] }
  0xee   :  { %582 = vmatprep.subr.mxu1 %v816_v7  ;;  %v114_v22 = vadd.f32 0.02, %v113_v21  ;;  %633 = vmatpush3.msra.mxu0 %v417_v4 }
  0xef   :  { %583 = vmatpush3.msra.mxu1 %v125_v20  ;;  %634 = vmatprep.subr.mxu0 %v816_v7 }
  0xf0   :  { %585 = vmatmul.mubr.msk.f32.vlgmr.msra.gmra.mxu1 %vm107_vm1, %v114_v22  ;;  %587 = vmatprep.subr.mxu1 %v816_v7 }
  0xf1   :  { %588 = vmatpush3.msra.mxu1 %v299_v23  ;;  %603 = vmatprep.mubr.msk.f32.mxu1 %vm817_vm3, %v816_v7 }
  0xf2   :  { %589 = vmatprep.subr.mxu1 %v816_v7  ;;  %635 = vmatpush3.msra.mxu0 %v416_v5 }
  0xf3   :  { %590 = vmatpush3.msra.mxu1 %v298_v24  ;;  %636 = vmatprep.subr.mxu0 %v816_v7 }
  0xf4   :  { %591 = vmatprep.subr.mxu1 %v816_v7  ;;  %637 = vmatpush3.msra.mxu0 %v415_v6 }
  0xf5   :  { %592 = vmatpush3.msra.mxu1 %v297_v25 }
  0xf6   :  { %593 = vmatprep.subr.mxu1 %v816_v7 }
  0xf7   :  { %594 = vmatpush3.msra.mxu1 %v296_v26 }
  0xf8   :  { %595 = vmatprep.subr.mxu1 %v816_v7 }
  0xf9   :  { %596 = vmatpush3.msra.mxu1 %v295_v27 }
  0xfa   :  { %597 = vmatprep.subr.mxu1 %v816_v7 }
  0xfb   :  { %598 = vmatpush3.msra.mxu1 %v294_v28 }
  0xfc   :  { %599 = vmatprep.subr.mxu1 %v816_v7 }
  0xfd   :  { %600 = vmatpush3.msra.mxu1 %v293_v29 }
  0xfe   :  { %601 = vmatprep.subr.mxu1 %v816_v7 }
  0xff   :  { %602 = vmatpush3.msra.mxu1 %v292_v30 }
 0x1ac   :  { %v204_v31 = vpop.f32.mrf.mxu1 }
 0x1ae   :  { %v579_v32 = vpop.f32.mrf.mxu1 }
 0x1b0   :  { %v281_v33 = vpop.f32.mrf.mxu1 }
 0x1b1   :  { %v282_v35 = vadd.f32 %v281_v33, %v204_v31 }
 0x1b2   :  { %v586_v36 = vpop.f32.mrf.mxu1 }
 0x1b3   :  { %v290_v37 = vadd.f32 %v529_v34, %v282_v35 }
 0x1b5   :  { %v291_v38 = vmax.f32 %v290_v37, 0.0 }
 0x1b7   :  { %604 = vmatmul.mubr.msk.f32.vlgmr.msra.gmra.mxu1 %vm305_vm5, %v291_v38 }
 0x277   :  { %v375_v42 = vpop.f32.mrf.mxu1 }
 0x278   :  { %v376_v43 = vadd.f32 %v530_v41, %v375_v42 }
 0x279   :  { %v605_v44 = vpop.f32.mrf.mxu1 }
 0x27a   :  { %v382_v45 = vsel %vm381_vm6, %v376_v43, 0.0  ;;  %v385_v46 = vsel %vm381_vm6, 0.0, %v376_v43 }
 0x27b   :  { %383 = vadd.xlane.f32.xlu1 %v382_v45 }
 0x27f   :  { %386 = vadd.xlane.f32.xlu1 %v385_v46 }
 0x304   :  { %v384_v50 = vpop.xlane.xlu1 %383 }
 0x308   :  { %v387_v51 = vpop.xlane.xlu1 %386 }
 0x309   :  { %v388_v52 = vsel %vm381_vm6, %v384_v50, %v387_v51 }
 0x30a   :  { %v389_v53 = vmul.f32 0.015625, %v388_v52 }
 0x30c   :  { %v390_v54 = vsub.f32 %v376_v43, %v389_v53 }
 0x30e   :  { %v391_v55 = vmul.f32 %v390_v54, %v390_v54 }
 0x310   :  { %v395_v56 = vsel %vm381_vm6, 0.0, %v391_v55  ;;  %v392_v57 = vsel %vm381_vm6, %v391_v55, 0.0 }
 0x311   :  { %396 = vadd.xlane.f32.xlu1 %v395_v56  ;;  %393 = vadd.xlane.f32.xlu0 %v392_v57 }
 0x39a   :  { %v397_v8 = vpop.xlane.xlu1 %396  ;;  %v394_v9 = vpop.xlane.xlu0 %393 }
 0x39b   :  { %v398_v10 = vsel %vm381_vm6, %v394_v9, %v397_v8 }
 0x39c   :  { %v399_v11 = vmul.f32 0.015625, %v398_v10 }
 0x39e   :  { %v400_v12 = vadd.f32 1e-05, %v399_v11 }
 0x3a0   :  { %656 = vrsqrt.f32 %v400_v12 }
 0x3ad   :  { %v657_v13 = vpop.eup %656 }
 0x3ae   :  { %v402_v15 = vmul.f32 %v657_v13, %v390_v54 }
 0x3b0   :  { %v408_v7 = vmul.f32 %v532_v14, %v402_v15 }
 0x3b2   :  { %v414_v17 = vadd.f32 %v533_v16, %v408_v7 }
 0x3b4   :  { %639 = vmatmul.mubr.f32.vlgmr.msra.gmra.mxu0 %v414_v17 }
 0x474   :  { %v502_v19 = vpop.f32.mrf.mxu0 }
 0x475   :  { %v503_v20 = vadd.f32 %v534_v18, %v502_v19 }
 0x476   :  { %v640_v21 = vpop.f32.mrf.mxu0 }
 0x477   :  { %506 = vst [vmem:[#allocation13] sm:$0xff] %v503_v20 }
 0x478   :  { %789 = shalt.err (!%p786_p6)
}
 0x479   :  { %516 = dma.vmem_to_hbm [thread:$0]  %s514_s1, 128, %s971_s7, [#allocation4]  }
 0x47a   :  { %806 = dma.done.wait [#allocation4], 128  }
 0x47b   :  { %807 = vsyncadd [#allocation4], 4294967168 }
 0x47c   :  { %520 = vsyncpa [#allocation3], 1 }
 0x47d   :  { %521 = vsyncpa [#allocation6], 1 }
 0x47e   :  { %522 = vsyncpa [#allocation9], 1 }
 0x47f   :  { %523 = vsyncpa [#allocation12], 1 }
 0x480   :  { %524 = vsyncpa [#allocation4], 1 }

</bundles_post_ra>
